<compile_context>
chip_gen: v7x
topology: tpu7x:2x2x1
jax: 0.10.0
libtpu: 0.0.40
codegen_flags: <defaults>
</compile_context>

<pallas_src>
import functools
import math

import jax
import jax.numpy as jnp
from jax.experimental import pallas as pl
from jax.experimental.pallas import tpu as pltpu


def _round_up(x: int, m: int) -> int:
    return -(-x // m) * m


def _segment_embedding_kernel(ids_rep_ref, table_ref, out_ref, *, segment_size):
    # ids_rep_ref: (tile_rows, k)       int8/int32, ids_rep[r, p*S+s] = ids[r, p]
    # table_ref:   (k, width)           f32, pre-scaled block-diagonal table
    #                                   (VMEM resident, copied in once)
    # out_ref:     (tile_rows, width)   output tile (lane-dense, width % 128 == 0)
    tile_rows, k = ids_rep_ref.shape

    # One compare against the constant lane pattern (iota % S) builds the
    # one-hot; out-of-range ids match nothing -> zero row (documented).
    lane = jax.lax.broadcasted_iota(jnp.int32, (tile_rows, k), 1)
    pattern = lane % segment_size
    onehot = (ids_rep_ref[...].astype(jnp.int32) == pattern).astype(table_ref.dtype)

    # MXU gather: (tile_rows, k) @ (k, width).  K is tiny so utilization is
    # low, but the MXU has nothing else to do and the VALU is freed up.
    out = jnp.dot(onehot, table_ref[...],
                  preferred_element_type=jnp.float32,
                  precision=jax.lax.Precision.HIGHEST)
    out_ref[...] = out.astype(out_ref.dtype)


def segment_embedding_forward(segment_ids: jax.Array,
                              table: jax.Array,
                              *,
                              target_out_tile_bytes: int = 8 * 1024 * 1024,
                              out_dtype=None) -> jax.Array:
    """Pallas equivalent of SegmentEmbedding.forward.

    segment_ids: int array, any shape (e.g. (batch, seq))
    table:       (segment_size, embedding_size) float
    returns:     segment_ids.shape + (embedding_size,), dtype = table.dtype
    """
    in_shape = segment_ids.shape
    segment_size, emb = table.shape
    scale = float(emb) ** 0.5
    if out_dtype is None:
        out_dtype = table.dtype

    # Lane-dense packing: fold `pack` tokens per output row so the stored row
    # width is a multiple of 128 lanes (unmasked full-width stores).
    pack = 128 // math.gcd(emb, 128)
    width = pack * emb
    k = pack * segment_size                       # one-hot / expanded-table K dim

    n_tokens = math.prod(in_shape) if in_shape else 1
    rows = max(1, -(-n_tokens // pack))

    # --- dtypes & per-row VMEM footprints (lane padding included) -------------
    ids_dtype = jnp.int8 if segment_size <= 127 else jnp.int32
    ids_itemsize = jnp.dtype(ids_dtype).itemsize
    out_itemsize = jnp.dtype(out_dtype).itemsize
    k_lanes = _round_up(k, 128)

    out_row = width * out_itemsize                # output tile bytes / row
    ids_row = k_lanes * ids_itemsize              # ids tile bytes / row (lane padded)
    onehot_row = k_lanes * 4                      # f32 one-hot intermediate / row
    # Conservative per-row budget: double-buffered in/out + in-kernel temps.
    per_row = 2 * (out_row + ids_row + onehot_row)
    table_bytes = _round_up(k, 8) * width * 4

    # --- VMEM budget: v7x has the smallest VMEM (64 MiB phys / 32 MiB scoped).
    #     Use at most half the physical size, capped at 24 MiB, minus the
    #     resident table and a small margin; raise the scoped limit to match.
    phys_vmem = 64 << 20
    try:
        phys_vmem = int(pltpu.get_tpu_info().vmem_capacity_bytes)
    except Exception:
        pass
    budget = min(phys_vmem // 2, 24 << 20) - table_bytes - (2 << 20)
    budget = max(budget, 1 << 20)

    row_align = 32                                # int8 sublane tile; multiple of 8
    cap_rows = max(row_align, (budget // per_row) // row_align * row_align)
    tgt_rows = max(row_align,
                   (target_out_tile_bytes // out_row) // row_align * row_align)
    ideal_rows = min(cap_rows, tgt_rows)

    rows_rounded = _round_up(rows, row_align)
    n_steps = -(-rows_rounded // ideal_rows)
    if rows_rounded >= 2 * row_align:
        # Keep >= 2 (even) grid steps so "parallel" feeds both v7x TensorCores.
        n_steps = max(2, n_steps)
        if n_steps % 2:
            n_steps += 1
    tile_rows = _round_up(-(-rows_rounded // n_steps), row_align)
    n_steps = -(-rows_rounded // tile_rows)
    padded_rows = n_steps * tile_rows
    grid = (n_steps,)

    # --- inputs ---------------------------------------------------------------
    # ids padded with 0 to the packed/tiled shape (pad rows are sliced off);
    # replicated S times per token so the kernel needs only ONE compare.
    ids_flat = segment_ids.reshape(-1).astype(jnp.int32)
    pad = padded_rows * pack - n_tokens
    if pad:
        ids_flat = jnp.pad(ids_flat, (0, pad))
    ids_2d = ids_flat.reshape(padded_rows, pack)
    ids_rep = jnp.repeat(ids_2d, segment_size, axis=1).astype(ids_dtype)

    # Pre-scaled block-diagonal table: big[p*S+s, p*emb:(p+1)*emb] = scale*table[s].
    scaled = table.astype(jnp.float32) * scale                     # (S, emb)
    eye_p = jnp.eye(pack, dtype=jnp.float32)                       # (pack, pack)
    big_table = jnp.einsum("pq,se->psqe", eye_p, scaled).reshape(k, width)

    kernel = functools.partial(_segment_embedding_kernel, segment_size=segment_size)

    vmem_limit = per_row * tile_rows + table_bytes + (4 << 20)
    vmem_limit = int(min(max(vmem_limit, 16 << 20), 30 << 20))

    cost = pl.CostEstimate(
        flops=2 * padded_rows * k * width,
        transcendentals=0,
        bytes_accessed=padded_rows * (out_row + k * ids_itemsize) + table_bytes,
    )

    out_packed = pl.pallas_call(
        kernel,
        out_shape=jax.ShapeDtypeStruct((padded_rows, width), out_dtype),
        grid=grid,
        in_specs=[
            # current tile of replicated token ids (int8, lane-cheap)
            pl.BlockSpec((tile_rows, k), lambda i: (i, 0)),
            # tiny expanded table, resident in VMEM, no per-step DMA
            pl.BlockSpec(memory_space=pltpu.MemorySpace.VMEM),
        ],
        out_specs=pl.BlockSpec((tile_rows, width), lambda i: (i, 0)),
        compiler_params=pltpu.CompilerParams(
            dimension_semantics=("parallel",),
            vmem_limit_bytes=vmem_limit,
        ),
        cost_estimate=cost,
    )(ids_rep, big_table)

    # Unpack lane-dense rows back to one-token-per-row and drop the pad.
    # TODO(synk): when pad > 0 this slice is an extra copy on a writeback-bound
    # kernel; callers padding seq to a multiple of pack*row_align avoid it.
    out = out_packed.reshape(padded_rows * pack, emb)[:n_tokens]
    return out.reshape(*in_shape, emb)


if __name__ == "__main__":
    # Module hyper-params (synthetic, deterministic init).
    segment_size = 4
    embedding_size = 32
    batch, seq = 2, 8

    key = jax.random.PRNGKey(0)
    k_table, k_ids = jax.random.split(key)

    # nn.Embedding weight ~ N(0, embedding_size ** -0.5)
    table = (jax.random.normal(k_table, (segment_size, embedding_size),
                               dtype=jnp.float32)
             * (embedding_size ** -0.5))
    segment_ids = jax.random.randint(k_ids, (batch, seq), 0, segment_size,
                                     dtype=jnp.int32)

    out = segment_embedding_forward(segment_ids, table)
    out = jax.block_until_ready(out)

    # Reference check in plain JAX.
    ref = (embedding_size ** 0.5) * table[segment_ids]
    assert out.shape == (batch, seq, embedding_size)
    assert out.dtype == table.dtype
    assert jnp.allclose(out, ref, atol=1e-5, rtol=1e-5)

    print("KERNEL_OK")
</pallas_src>

<mosaic_0001>
module attributes {stable_mosaic.version = 11 : i64} {
  func.func @_segment_embedding_kernel(%arg0: i32, %arg1: memref<32x16xi8, #tpu.memory_space<vmem>>, %arg2: memref<16x128xf32, #tpu.memory_space<vmem>>, %arg3: memref<32x128xf32, #tpu.memory_space<vmem>>) attributes {dimension_semantics = [#tpu.dimension_semantics<parallel>], iteration_bounds = array<i64: 1>, scalar_prefetch = 0 : i64, scratch_operands = 0 : i64, tpu.core_type = #tpu.core_type<tc>, window_params = [{transform_indices = @transform_0, window_bounds = array<i64: 32, 16>}, {pipeline_mode = #tpu.pipeline_mode<synchronous>, transform_indices = @transform_1, window_bounds = array<i64: 16, 128>}, {transform_indices = @transform_2, window_bounds = array<i64: 32, 128>}]} {
    %0 = tpu.iota {dimensions = array<i32: 1>} : vector<32x16xi32>
    %c4_i32 = arith.constant 4 : i32
    %c0_i32 = arith.constant 0 : i32
    %1 = arith.cmpi eq, %c4_i32, %c0_i32 : i32
    %c1_i32 = arith.constant 1 : i32
    %2 = arith.select %1, %c1_i32, %c4_i32 : i32
    %3 = vector.broadcast %2 : i32 to vector<32x16xi32>
    %4 = arith.remsi %0, %3 : vector<32x16xi32>
    %c0_i32_0 = arith.constant 0 : i32
    %5 = vector.broadcast %c0_i32_0 : i32 to vector<32x16xi32>
    %6 = arith.cmpi ne, %4, %5 : vector<32x16xi32>
    %c0_i32_1 = arith.constant 0 : i32
    %7 = vector.broadcast %c0_i32_1 : i32 to vector<32x16xi32>
    %8 = arith.cmpi slt, %4, %7 : vector<32x16xi32>
    %c0_i32_2 = arith.constant 0 : i32
    %9 = arith.cmpi slt, %2, %c0_i32_2 : i32
    %10 = vector.broadcast %9 : i1 to vector<32x16xi1>
    %11 = vector.broadcast %10 : vector<32x16xi1> to vector<32x16xi1>
    %12 = arith.xori %8, %11 : vector<32x16xi1>
    %13 = arith.andi %12, %6 : vector<32x16xi1>
    %14 = vector.broadcast %2 : i32 to vector<32x16xi32>
    %15 = arith.addi %4, %14 : vector<32x16xi32>
    %16 = arith.select %13, %15, %4 : vector<32x16xi1>, vector<32x16xi32>
    %c0 = arith.constant 0 : index
    %c0_3 = arith.constant 0 : index
    %17 = vector.load %arg1[%c0, %c0_3] : memref<32x16xi8, #tpu.memory_space<vmem>>, vector<32x16xi8>
    %18 = arith.extsi %17 : vector<32x16xi8> to vector<32x16xi32>
    %19 = arith.cmpi eq, %18, %16 : vector<32x16xi32>
    %20 = arith.extui %19 : vector<32x16xi1> to vector<32x16xi32>
    %21 = arith.sitofp %20 : vector<32x16xi32> to vector<32x16xf32>
    %c0_4 = arith.constant 0 : index
    %c0_5 = arith.constant 0 : index
    %22 = vector.load %arg2[%c0_4, %c0_5] : memref<16x128xf32, #tpu.memory_space<vmem>>, vector<16x128xf32>
    %cst = arith.constant dense<0.000000e+00> : vector<32x128xf32>
    %23 = tpu.matmul %21, %22, %cst {dimension_numbers = #tpu.dot_dimension_numbers<[1], [0], [0], [1], [0, 0, 1, 1], [], []>, precision = #tpu.contract_precision<fp32>} : vector<32x16xf32>, vector<16x128xf32>, vector<32x128xf32> -> vector<32x128xf32>
    %c0_6 = arith.constant 0 : index
    %c0_7 = arith.constant 0 : index
    %24 = vector.load %arg3[%c0_6, %c0_7] : memref<32x128xf32, #tpu.memory_space<vmem>>, vector<32x128xf32>
    tpu.vector_store %arg3[%c0_6, %c0_7], %23 {strides = array<i32>} : memref<32x128xf32, #tpu.memory_space<vmem>>, vector<32x128xf32>,
    return
  }
  func.func @transform_0(%arg0: i32) -> (i32, i32) {
    %c0_i32 = arith.constant 0 : i32
    %c0_i32_0 = arith.constant 0 : i32
    return %arg0, %c0_i32 : i32, i32
  }
  func.func @transform_1(%arg0: i32) -> (i32, i32) {
    %c0_i32 = arith.constant 0 : i32
    %c0_i32_0 = arith.constant 0 : i32
    %c0_i32_1 = arith.constant 0 : i32
    return %c0_i32, %c0_i32_0 : i32, i32
  }
  func.func @transform_2(%arg0: i32) -> (i32, i32) {
    %c0_i32 = arith.constant 0 : i32
    %c0_i32_0 = arith.constant 0 : i32
    return %arg0, %c0_i32 : i32, i32
  }
}

</mosaic_0001>

<bundles_post_ra>
// kernel: tpu_custom_call.1
= control target key start
LH: loop header
LB: loop body
LE: loop exit
PB: predicated region body
PF: predicated region fallthrough
CT: control target
= control target key end

     0   :  { %7 = vsyncpa [#allocation3], 0  ;;  %s979_s0 = inlined_call_operand.vmem [shape: s8[32,16], index: 0, kind: input, shape index: {}]   ;;  %s980_s1 = inlined_call_operand.hbm [shape: f32[16,128], index: 1, kind: input, shape index: {}]   ;;  %s981_s2 = inlined_call_operand.hbm [shape: f32[32,128], index: 2, kind: output, shape index: {}]  }
   0x1   :  { %8 = vsyncpa [#allocation4], 0  ;;  %s890_s9 = smov [#allocation2]   ;;  %s842_s13 = scalar_lea.hbm %s980_s1, 256 }
   0x2   :  { %s16_s10 = sshll.u32 %s890_s9, 4  ;;  %p843_p0 = scmp.ne.s32.totalorder %s980_s1, %s842_s13  ;;  %s17_s10 = int_to_ptr.vmem [resolvable:$true] %s16_s10 }
   0x3   :  { %p846_p1 = scmp.lt.u32.totalorder %s842_s13, %s980_s1 }
   0x5   :  { %p848_p2 = pnand %p846_p1, %p843_p0 }
   0x7   :  { %851 = shalt.err (!%p848_p2)
}
   0x8   :  { %s852_s18 = scalar_lea.vmem %s17_s10, 256  ;;  %p857_p4 = scmp.lt.s32.totalorder %s17_s10, %s17_s10 }
   0x9   :  { %p853_p3 = scmp.ne.s32.totalorder %s17_s10, %s852_s18  ;;  %p858_p5 = scmp.lt.s32.totalorder %s852_s18, %s852_s18 }
   0xb   :  { %p859_p6 = por %p858_p5, %p857_p4 }
   0xd   :  { %p860_p7 = pnand %p859_p6, %p853_p3 }
   0xf   :  { %863 = shalt.err (!%p860_p7)
}
  0x10   :  { %s891_s19 = smov 128   ;;  %s892_s20 = smov 8  }
  0x11   :  { %22 = dma.hbm_to_vmem [thread:$0]  %s980_s1, 256, %s17_s10, [#allocation3], %s891_s19, %s891_s19, %s892_s20  }
  0x12   :  { %886 = dma.done.wait [#allocation3], 256  }
  0x13   :  { %887 = vsyncadd [#allocation3], 4294967040  ;;  %v26_v0 = vlaneseq  ;;  %v57_v3 = vld [vmem:[#allocation2] sm:$0xff]  ;;  %v58_v4 = vld [vmem:[#allocation2 + $0x8] sm:$0xff]  ;;  %vm59_vm0 = vcmask 130048   ;;  %v893_v14 = vmov 0.0  }
  0x14   :  { %v40_v5 = vld [vmem:[%s979_s0] sm:$0xff]  ;;  %v73_v6 = vand.u32 4294901760, %v57_v3  ;;  %v76_v7 = vand.u32 4294901760, %v58_v4  ;;  %s894_s0 = smov [#allocation5]  }
  0x15   :  { %v27_v1 = vand.u32 127, %v26_v0  ;;  %v41_v8 = vunpack.c.0.s8 %v40_v5  ;;  %v42_v9 = vunpack.c.1.s8 %v40_v5  ;;  %v43_v10 = vunpack.c.2.s8 %v40_v5  ;;  %s669_s1 = sshll.u32 %s894_s0, 4  ;;  %s670_s1 = int_to_ptr.vmem [resolvable:$true] %s669_s1 }
  0x16   :  { %v44_v11 = vunpack.c.3.s8 %v40_v5  ;;  %v928_v12 = vpack.c.bf16 %v76_v7, %v73_v6  ;;  %v181_v13 = vsub.f32 %v57_v3, %v73_v6  ;;  %v188_v17 = vsub.f32 %v58_v4, %v76_v7  ;;  %s864_s25 = scalar_lea.vmem %s670_s1, 512  ;;  %p869_p9 = scmp.lt.s32.totalorder %s670_s1, %s670_s1 }
  0x17   :  { %v32_v2 = vand.u32 3, %v27_v1  ;;  %p865_p8 = scmp.ne.s32.totalorder %s670_s1, %s864_s25  ;;  %p870_p10 = scmp.lt.s32.totalorder %s864_s25, %s864_s25 }
  0x18   :  { %806 = vmatprep.subr.bf16.mxu0 %v928_v12  ;;  %794 = vmatprep.subr.bf16.mxu1 %v928_v12  ;;  %v182_v20 = vand.u32 4294901760, %v181_v13  ;;  %v189_v24 = vand.u32 4294901760, %v188_v17  ;;  %v801_v46 = vpack.c.bf16 %v188_v17, %v181_v13 }
  0x19   :  { %vm45_vm1 = vcmp.eq.s32.totalorder %v41_v8, %v32_v2  ;;  %vm46_vm2 = vcmp.eq.s32.totalorder %v42_v9, %v32_v2  ;;  %vm47_vm3 = vcmp.eq.s32.totalorder %v43_v10, %v32_v2  ;;  %808 = vmatpush3.bf16.msra.mxu0 %v928_v12  ;;  %796 = vmatpush3.bf16.msra.mxu1 %v928_v12  ;;  %p871_p11 = por %p870_p10, %p869_p9 }
  0x1a   :  { %v930_v15 = vsel %vm45_vm1, 1.0, %v893_v14  ;;  %v932_v16 = vsel %vm46_vm2, 1.0, %v893_v14  ;;  %v683_v21 = vsel %vm47_vm3, 1.0, %v893_v14  ;;  %v183_v26 = vsub.f32 %v181_v13, %v182_v20 }
  0x1b   :  { %v61_v18 = vsel %vm59_vm0, %v930_v15, 0  ;;  %v64_v19 = vsel %vm59_vm0, %v932_v16, 0  ;;  %v67_v25 = vsel %vm59_vm0, %v683_v21, 0  ;;  %vm48_vm4 = vcmp.eq.s32.totalorder %v44_v11, %v32_v2  ;;  %p872_p12 = pnand %p871_p11, %p865_p8 }
  0x1c   :  { %v140_v22 = vsub.f32 %v61_v18, %v61_v18  ;;  %v150_v23 = vsub.f32 %v64_v19, %v64_v19  ;;  %v160_v27 = vsub.f32 %v67_v25, %v67_v25  ;;  %v190_v30 = vsub.f32 %v188_v17, %v189_v24 }
  0x1d   :  { %v809_v31 = vpack.c.bf16 %v189_v24, %v182_v20  ;;  %v184_v32 = vand.u32 4294901760, %v183_v26  ;;  %v684_v34 = vsel %vm48_vm4, 1.0, %v893_v14 }
  0x1e   :  { %v141_v28 = vand.u32 4294901760, %v140_v22  ;;  %v151_v29 = vand.u32 4294901760, %v150_v23  ;;  %v161_v33 = vand.u32 4294901760, %v160_v27  ;;  %v191_v36 = vand.u32 4294901760, %v190_v30 }
  0x1f   :  { %810 = vmatprep.subr.bf16.mxu0 %v809_v31  ;;  %v70_v38 = vsel %vm59_vm0, %v684_v34, 0 }
  0x20   :  { %767 = vmatprep.mubr.f32.mxu0 %v141_v28  ;;  %v142_v35 = vsub.f32 %v140_v22, %v141_v28  ;;  %v152_v37 = vsub.f32 %v150_v23, %v151_v29  ;;  %v170_v39 = vsub.f32 %v70_v38, %v70_v38  ;;  %v162_v40 = vsub.f32 %v160_v27, %v161_v33 }
  0x21   :  { %768 = vmatmul.mubr.f32.vlgmr.msra.gmra.mrb[0].mxu0 %v151_v29  ;;  %v797_v42 = vpack.c.bf16 %v191_v36, %v184_v32 }
  0x22   :  { %v143_v41 = vand.u32 4294901760, %v142_v35  ;;  %770 = vmatprep.mubr.f32.mxu0 %v161_v33  ;;  %v153_v43 = vand.u32 4294901760, %v152_v37  ;;  %812 = vmatpush3.bf16.msra.mxu0 %v809_v31  ;;  %v171_v44 = vand.u32 4294901760, %v170_v39  ;;  %v163_v45 = vand.u32 4294901760, %v162_v40 }
  0x23   :  { %814 = vmatprep.subr.bf16.mxu0 %v928_v12  ;;  %798 = vmatprep.subr.bf16.mxu1 %v797_v42 }
  0x24   :  { %737 = vmatprep.mubr.f32.mxu1 %v143_v41  ;;  %v172_v47 = vsub.f32 %v170_v39, %v171_v44 }
  0x25   :  { %738 = vmatmul.mubr.f32.vlgmr.msra.gmra.mrb[0].mxu1 %v153_v43  ;;  %771 = vmatmul.mubr.f32.gmra.mrb[2].mxu0 %v171_v44 }
  0x26   :  { %800 = vmatpush3.bf16.msra.mxu1 %v797_v42  ;;  %740 = vmatprep.mubr.f32.mxu1 %v163_v45  ;;  %v173_v48 = vand.u32 4294901760, %v172_v47 }
  0x27   :  { %777 = vmatprep.mubr.msk.f32.mxu0 %vm59_vm0, %v930_v15  ;;  %802 = vmatprep.subr.bf16.mxu1 %v801_v46 }
  0x29   :  { %741 = vmatmul.mubr.f32.gmra.mrb[2].mxu1 %v173_v48  ;;  %778 = vmatmul.mubr.msk.f32.vlgmr.msra.gmra.mrb[0].mxu0 %vm59_vm0, %v932_v16 }
  0x2a   :  { %747 = vmatprep.mubr.msk.f32.mxu1 %vm59_vm0, %v930_v15  ;;  %780 = vmatprep.mubr.msk.f32.mxu0 %vm59_vm0, %v683_v21 }
  0x2b   :  { %816 = vmatpush3.bf16.msra.mxu0 %v928_v12 }
  0x2d   :  { %748 = vmatmul.mubr.msk.f32.vlgmr.msra.gmra.mrb[0].mxu1 %vm59_vm0, %v932_v16  ;;  %781 = vmatmul.mubr.msk.f32.gmra.mrb[2].mxu0 %vm59_vm0, %v684_v34 }
  0x2e   :  { %804 = vmatpush3.bf16.msra.mxu1 %v801_v46  ;;  %750 = vmatprep.mubr.msk.f32.mxu1 %vm59_vm0, %v683_v21 }
  0x2f   :  { %787 = vmatprep.mubr.msk.f32.mxu0 %vm59_vm0, %v930_v15 }
  0x31   :  { %751 = vmatmul.mubr.msk.f32.gmra.mrb[2].mxu1 %vm59_vm0, %v684_v34  ;;  %788 = vmatmul.mubr.msk.f32.vlgmr.msra.gmra.mrb[0].mxu0 %vm59_vm0, %v932_v16 }
  0x32   :  { %757 = vmatprep.mubr.f32.mxu1 %v140_v22  ;;  %790 = vmatprep.mubr.msk.f32.mxu0 %vm59_vm0, %v683_v21 }
  0x35   :  { %758 = vmatmul.mubr.f32.vlgmr.msra.gmra.mrb[0].mxu1 %v150_v23  ;;  %791 = vmatmul.mubr.msk.f32.gmra.mrb[2].mxu0 %vm59_vm0, %v684_v34 }
  0x36   :  { %760 = vmatprep.mubr.f32.mxu1 %v160_v27 }
  0x39   :  { %761 = vmatmul.mubr.f32.gmra.mrb[2].mxu1 %v170_v39 }
 0x104   :  { %v789_v49 = vpop.f32.mrb[0].mxu0 }
 0x105   :  { %v638_v50 = vpop.f32.mrb[1].mxu0 }
 0x108   :  { %v759_v51 = vpop.f32.mrb[0].mxu1  ;;  %v792_v52 = vpop.f32.mrb[2].mxu0 }
 0x109   :  { %v817_v53 = vadd.f32 %v789_v49, %v759_v51  ;;  %v350_v54 = vpop.f32.mrb[1].mxu1  ;;  %v650_v55 = vpop.f32.mrb[3].mxu0 }
 0x10a   :  { %v818_v56 = vadd.f32 %v638_v50, %v350_v54 }
 0x10b   :  { %661 = vst [vmem:[#allocation5 + $0x8] sm:$0xff] %v817_v53 }
 0x10c   :  { %660 = vst [vmem:[#allocation5] sm:$0xff] %v818_v56  ;;  %v762_v57 = vpop.f32.mrb[2].mxu1 }
 0x10d   :  { %v819_v58 = vadd.f32 %v792_v52, %v762_v57  ;;  %v364_v59 = vpop.f32.mrb[3].mxu1 }
 0x10e   :  { %v820_v60 = vadd.f32 %v650_v55, %v364_v59 }
 0x10f   :  { %663 = vst [vmem:[#allocation5 + $0x18] sm:$0xff] %v819_v58 }
 0x110   :  { %662 = vst [vmem:[#allocation5 + $0x10] sm:$0xff] %v820_v60 }
 0x111   :  { %875 = shalt.err (!%p872_p12)
}
 0x112   :  { %s876_s28 = scalar_lea.hbm %s981_s2, 512 }
 0x113   :  { %p877_p13 = scmp.ne.s32.totalorder %s981_s2, %s876_s28  ;;  %p880_p0 = scmp.lt.u32.totalorder %s876_s28, %s981_s2 }
 0x115   :  { %p882_p1 = pnand %p880_p0, %p877_p13 }
 0x117   :  { %885 = shalt.err (!%p882_p1)
}
 0x118   :  { %675 = dma.vmem_to_hbm [thread:$0]  %s670_s1, 512, %s981_s2, [#allocation4], %s891_s19, %s891_s19, %s892_s20  }
 0x119   :  { %888 = dma.done.wait [#allocation4], 512  }
 0x11a   :  { %889 = vsyncadd [#allocation4], 4294966784 }
 0x11b   :  { %679 = vsyncpa [#allocation3], 1 }
 0x11c   :  { %680 = vsyncpa [#allocation4], 1 }

</bundles_post_ra>
